<compile_context>
chip_gen: v7x
topology: tpu7x:2x2x1
jax: 0.10.0
libtpu: 0.0.40
codegen_flags: <defaults>
</compile_context>

<pallas_src>
import jax
import jax.numpy as jnp
from jax import lax
from jax.experimental import pallas as pl
from jax.experimental.pallas import tpu as pltpu


# ---------------------------------------------------------------------------
# Explicit MXU precision decision: the PyTorch reference is a float32 matmul,
# so operands stay float32 and the contraction is pinned to full-f32
# (multi-pass) MXU precision.  If the accuracy budget allows, casting the
# operands to bf16 (keeping preferred_element_type=f32) gives ~4-8x MXU
# throughput on v6e/v7x — flip this constant and cast to opt in.
_MM_PRECISION = lax.Precision.HIGHEST


def _vmem_budget_bytes() -> int:
    """Generation-aware VMEM budget for operand blocks (leaves headroom)."""
    try:
        cap = int(pltpu.get_tpu_info().vmem_capacity_bytes)
    except Exception:
        cap = 64 << 20  # conservative (v7x-sized) fallback
    # ~16 MiB on v7x (64 MiB physical), capped at 24 MiB on v5e/v6e (128 MiB).
    return min(cap // 4, 24 << 20)


# ---------------------------------------------------------------------------
# Small-S path: fold several batch elements into one grid step; one canonical
# matmul + one (S, S) transpose per batch element inside a fori_loop.
def _small_kernel(a_ref, o_ref):
    bt = a_ref.shape[0]  # static

    def body(b, carry):
        x = a_ref[b]                                           # (S, S)
        d = jnp.dot(x, x, preferred_element_type=jnp.float32,
                    precision=_MM_PRECISION)                   # (A @ A)[b]
        o_ref[b] = d.T.astype(o_ref.dtype)                     # (A^T @ A^T)[b]
        return carry

    lax.fori_loop(0, bt, body, 0, unroll=bt <= 8)


def _small_path(a: jax.Array, budget: int) -> jax.Array:
    B, S, _ = a.shape
    itemsize = jnp.dtype(a.dtype).itemsize

    # VMEM per folded batch element: (input + output) block, double-buffered.
    per_batch = 4 * S * S * itemsize
    bt_cap = max(1, budget // per_batch)
    # Keep >= ~4 grid steps when B allows so v7x's two TensorCores and the
    # DMA/compute pipeline have work; bt no longer has to divide B.
    bt = max(1, min(bt_cap, B, pl.cdiv(B, 4)))
    grid = (pl.cdiv(B, bt),)  # ragged last block: OOB stores are dropped

    need = bt * per_batch
    vmem_limit = int(need + (4 << 20)) if need > (12 << 20) else None

    cost = pl.CostEstimate(
        flops=2 * B * S ** 3,
        transcendentals=0,
        bytes_accessed=int(2 * B * S * S * itemsize),
    )

    return pl.pallas_call(
        _small_kernel,
        out_shape=jax.ShapeDtypeStruct((B, S, S), a.dtype),
        grid_spec=pltpu.PrefetchScalarGridSpec(
            num_scalar_prefetch=0,
            grid=grid,
            in_specs=[pl.BlockSpec((bt, S, S), lambda g: (g, 0, 0))],
            out_specs=pl.BlockSpec((bt, S, S), lambda g: (g, 0, 0)),
        ),
        compiler_params=pltpu.CompilerParams(
            dimension_semantics=("parallel",),
            vmem_limit_bytes=vmem_limit,
        ),
        cost_estimate=cost,
    )(a)


# ---------------------------------------------------------------------------
# Large-S path: full-K panels, no reduction grid axis, no accumulator.
# Grid point (b, i, j) produces output block C[b, i-block, j-block] where
#   C = A^T @ A^T = (A @ A)^T
#   p = A[j-rows, :] @ A[:, i-cols]  == (A @ A)[j-block, i-block]   (tn, tm)
#   C[i-block, j-block] = p^T                                        (tm, tn)
def _panel_kernel(lhs_ref, rhs_ref, o_ref):
    p = jnp.dot(lhs_ref[0], rhs_ref[0], preferred_element_type=jnp.float32,
                precision=_MM_PRECISION)
    o_ref[0] = p.T.astype(o_ref.dtype)


def _panel_path(a: jax.Array, budget: int) -> jax.Array:
    B, S, _ = a.shape
    itemsize = jnp.dtype(a.dtype).itemsize

    # Largest tile in {512, 256, 128} dividing S whose double-buffered panels
    # (lhs (tn,S), rhs (S,tm), out (tm,tn)) fit the VMEM budget.
    tile = 128
    for t in (512, 256, 128):
        if S % t == 0 and 2 * (2 * t * S + t * t) * itemsize <= budget:
            tile = t
            break
    # TODO(synk): for S so large that even (128, S) full-K panels exceed the
    # VMEM budget (S beyond ~12K at f32), a K-tiled accumulator fallback is
    # needed; irrelevant for the shapes this module is used with.
    tm = tn = tile
    need = 2 * (2 * tile * S + tile * tile) * itemsize
    vmem_limit = int(need + (4 << 20)) if need > (12 << 20) else None

    cost = pl.CostEstimate(
        flops=2 * B * S ** 3,
        transcendentals=0,
        # (1 + S/tm) input reads + 1 output write, per the chosen blocking.
        bytes_accessed=int(B * S * S * itemsize * (2 + S // tm)),
    )

    grid = (B, S // tm, S // tn)  # j innermost -> rhs panel stays resident
    return pl.pallas_call(
        _panel_kernel,
        out_shape=jax.ShapeDtypeStruct((B, S, S), a.dtype),
        grid_spec=pltpu.PrefetchScalarGridSpec(
            num_scalar_prefetch=0,
            grid=grid,
            in_specs=[
                # A[b, j*tn:(j+1)*tn, :]   -- streamed over innermost j
                pl.BlockSpec((1, tn, S), lambda b, i, j: (b, j, 0)),
                # A[b, :, i*tm:(i+1)*tm]  -- index independent of j: resident
                pl.BlockSpec((1, S, tm), lambda b, i, j: (b, 0, i)),
            ],
            out_specs=pl.BlockSpec((1, tm, tn), lambda b, i, j: (b, i, j)),
        ),
        compiler_params=pltpu.CompilerParams(
            dimension_semantics=("parallel", "parallel", "parallel"),
            vmem_limit_bytes=vmem_limit,
        ),
        cost_estimate=cost,
    )(a, a)


# ---------------------------------------------------------------------------
def permute_matmul(a: jax.Array) -> jax.Array:
    """v0[b] = a[b].T @ a[b].T == torch.matmul(a.permute(0,2,1), a.permute(0,2,1))."""
    B, S1, S2 = a.shape
    assert S1 == S2, "matmul(x1, x1) requires a square per-batch matrix"
    S = S1
    itemsize = jnp.dtype(a.dtype).itemsize
    budget = _vmem_budget_bytes()

    if S % 128 == 0 and S >= 256:
        return _panel_path(a, budget)

    # Batch-folded path needs whole (S, S) blocks (in + out, double-buffered)
    # resident in VMEM.
    if 4 * S * S * itemsize <= budget:
        return _small_path(a, budget)

    # Big S that is not a multiple of 128: zero-pad (exact for this op, since
    # padded rows/cols only contribute zero terms) and use the panel path.
    s_pad = ((S + 127) // 128) * 128
    a_pad = jnp.pad(a, ((0, 0), (0, s_pad - S), (0, s_pad - S)))
    return _panel_path(a_pad, budget)[:, :S, :S]


if __name__ == "__main__":
    # Spec-sized test (matches the PyTorch module usage): batch=2, square S=32.
    key = jax.random.PRNGKey(0)
    B, S = 2, 32
    a = jax.random.normal(key, (B, S, S), dtype=jnp.float32)
    out = permute_matmul(a)
    jax.block_until_ready(out)
    x1 = jnp.transpose(a, (0, 2, 1))
    ref = jnp.matmul(x1, x1, precision=lax.Precision.HIGHEST)
    assert out.shape == (B, S, S)
    err = float(jnp.max(jnp.abs(out - ref)) / jnp.max(jnp.abs(ref)))
    assert err < 2e-2, err

    # Small path with a batch count that previously forced bt=1 via the
    # divisor rule (now handled by cdiv) and a non-power-of-two S.
    a1 = jax.random.normal(jax.random.PRNGKey(1), (3, 64, 64), dtype=jnp.float32)
    out1 = permute_matmul(a1)
    jax.block_until_ready(out1)
    x1b = jnp.transpose(a1, (0, 2, 1))
    ref1 = jnp.matmul(x1b, x1b, precision=lax.Precision.HIGHEST)
    err1 = float(jnp.max(jnp.abs(out1 - ref1)) / jnp.max(jnp.abs(ref1)))
    assert out1.shape == (3, 64, 64)
    assert err1 < 2e-2, err1

    # Large-S panel path (full-K panels, resident column panel).
    a2 = jax.random.normal(jax.random.PRNGKey(2), (2, 256, 256), dtype=jnp.float32)
    out2 = permute_matmul(a2)
    jax.block_until_ready(out2)
    x2 = jnp.transpose(a2, (0, 2, 1))
    ref2 = jnp.matmul(x2, x2, precision=lax.Precision.HIGHEST)
    err2 = float(jnp.max(jnp.abs(out2 - ref2)) / jnp.max(jnp.abs(ref2)))
    assert out2.shape == (2, 256, 256)
    assert err2 < 1e-2, err2

    print("KERNEL_OK")
</pallas_src>

<mosaic_0001>
module attributes {stable_mosaic.version = 11 : i64} {
  func.func @_small_kernel(%arg0: i32, %arg1: memref<1x32x32xf32, #tpu.memory_space<vmem>>, %arg2: memref<1x32x32xf32, #tpu.memory_space<vmem>>) attributes {dimension_semantics = [#tpu.dimension_semantics<parallel>], iteration_bounds = array<i64: 2>, scalar_prefetch = 0 : i64, scratch_operands = 0 : i64, tpu.core_type = #tpu.core_type<tc>, window_params = [{transform_indices = @transform_0, window_bounds = array<i64: 1, 32, 32>}, {transform_indices = @transform_1, window_bounds = array<i64: 1, 32, 32>}]} {
    %c0_i32 = arith.constant 0 : i32
    %0 = arith.index_cast %c0_i32 : i32 to index
    %c0 = arith.constant 0 : index
    %c0_0 = arith.constant 0 : index
    %1 = vector.load %arg1[%0, %c0, %c0_0] : memref<1x32x32xf32, #tpu.memory_space<vmem>>, vector<1x32x32xf32>
    %2 = vector.shape_cast %1 : vector<1x32x32xf32> to vector<32x32xf32>
    %cst = arith.constant dense<0.000000e+00> : vector<32x32xf32>
    %3 = tpu.matmul %2, %2, %cst {dimension_numbers = #tpu.dot_dimension_numbers<[1], [0], [0], [1], [0, 0, 1, 1], [], []>, precision = #tpu.contract_precision<fp32>} : vector<32x32xf32>, vector<32x32xf32>, vector<32x32xf32> -> vector<32x32xf32>
    %4 = tpu.transpose %3, [1, 0] : vector<32x32xf32> -> vector<32x32xf32>
    %5 = arith.index_cast %c0_i32 : i32 to index
    %c0_1 = arith.constant 0 : index
    %c0_2 = arith.constant 0 : index
    %6 = vector.load %arg2[%5, %c0_1, %c0_2] : memref<1x32x32xf32, #tpu.memory_space<vmem>>, vector<1x32x32xf32>
    %7 = vector.shape_cast %6 : vector<1x32x32xf32> to vector<32x32xf32>
    %8 = vector.shape_cast %4 : vector<32x32xf32> to vector<1x32x32xf32>
    tpu.vector_store %arg2[%5, %c0_1, %c0_2], %8 {strides = array<i32>} : memref<1x32x32xf32, #tpu.memory_space<vmem>>, vector<1x32x32xf32>,
    %c1_i32 = arith.constant 1 : i32
    return
  }
  func.func @transform_0(%arg0: i32) -> (i32, i32, i32) {
    %c0_i32 = arith.constant 0 : i32
    %c0_i32_0 = arith.constant 0 : i32
    %c0_i32_1 = arith.constant 0 : i32
    return %arg0, %c0_i32, %c0_i32_0 : i32, i32, i32
  }
  func.func @transform_1(%arg0: i32) -> (i32, i32, i32) {
    %c0_i32 = arith.constant 0 : i32
    %c0_i32_0 = arith.constant 0 : i32
    %c0_i32_1 = arith.constant 0 : i32
    return %arg0, %c0_i32, %c0_i32_0 : i32, i32, i32
  }
}

</mosaic_0001>

<bundles_post_ra>
// kernel: tpu_custom_call.1
= control target key start
LH: loop header
LB: loop body
LE: loop exit
PB: predicated region body
PF: predicated region fallthrough
CT: control target
= control target key end

     0   :  { %6 = vsyncpa [#allocation3], 0  ;;  %s1499_s0 = inlined_call_operand.hbm [shape: f32[2,32,32], index: 0, kind: input, shape index: {}]   ;;  %s1500_s1 = inlined_call_operand.hbm [shape: f32[2,32,32], index: 1, kind: output, shape index: {}]  }
   0x1   :  { %8 = vsyncpa [#allocation3 + $0x1], 0 }
   0x2   :  { %9 = vsyncpa [#allocation4], 0 }
   0x3   :  { %11 = vsyncpa [#allocation4 + $0x1], 0  ;;  %s1270_s6 = smov 0   ;;  %s1272_s7 = smov 0  }
   0x4   :  { %s1274_s8 = smov 0   ;;  %s1276_s9 = smov 0  }
   0x5 LB: > { %s1291_s10 = sadd.s32 4294967295, %s1252_s9   ;;  %s889_s11 = sadd.s32 4294967294, %s1252_s9   ;;  %s1252_s9 = sphi %s1276_s9, %s1513_s9   ;;  %s1248_s8 = sphi %s1274_s8, %s1512_s8   ;;  %s1244_s7 = sphi %s1272_s7, %s1511_s7   ;;  %s1240_s6 = sphi %s1270_s6, %s1510_s6  }
   0x6   : > { %s1295_s12 = sadd.s32 1, %s1252_s9   ;;  %s24_s13 = sadd.s32 1, %s1248_s8 }
   0x7   : > { %s21_s14 = ssub.s32 %s1252_s9, %s1295_s12  ;;  %p31_p0 = scmp.ne.s32.totalorder %s1248_s8, %s1244_s7 }
   0x8   : > { %p22_p1 = scmp.eq.s32.totalorder %s21_s14, 0  ;;  %p32_p2 = scmp.eq.s32.totalorder %s1252_s9, 0 }
   0x9   : > { %p37_p3 = scmp.ne.s32.totalorder %s1244_s7, %s1240_s6  ;;  %p38_p4 = scmp.eq.s32.totalorder %s1291_s10, 0 }
   0xa   : > { %s1307_s15 = scalar_select %p22_p1, %s1248_s8, %s24_s13  }
   0xb   : > { %p1309_p5 = por %p32_p2, %p31_p0  ;;  %p1313_p6 = por %p38_p4, %p37_p3 }
   0xc   : > { %p61_p7 = scmp.eq.s32.totalorder %s1291_s10, 1  ;;  %p67_p8 = scmp.eq.s32.totalorder %s889_s11, 1 }
   0xd   : > { %p1117_p10 = scmp.lt.s32.totalorder %s1252_s9, 2  ;;  %s87_s20 = sand.u32 1, %s1248_s8  }
   0xe   : > { %p1320_p11 = por %p61_p7, %p31_p0  ;;  %p1324_p12 = por %p67_p8, %p37_p3 }
   0xf   : > { %s903_s21 = sshll.u32 %s1252_s9, 9  ;;  %s892_s22 = sshll.u32 %s87_s20, 5 }
  0x10   : > { %s1504_s18 = scalar_select %p1320_p11, 1, 0 }
  0x11   : > { %s1505_s19 = scalar_select %p1324_p12, 1, 0 }
  0x12   : > { %s1333_s25 = scalar_lea.hbm %s1499_s0, %s903_s21  ;;  %s91_s26 = scalar_lea.vmem [#allocation2], %s892_s22 }
  0x13   : > { %s98_s27 = sshll.u32 %s91_s26, 4  ;;  %p1337_p13 = pnand %p1117_p10, %p1309_p5  ;;  %s1341_s27 = int_to_ptr.vmem [resolvable:$true] %s98_s27 }
  0x14   : > { %s1343_s29 = scalar_lea.sflag [#allocation3], %s87_s20  ;;  %s1156_s30 = scalar_lea.hbm %s1333_s25, 512 }
  0x15   : > { %p1157_p0 = scmp.ne.s32.totalorder %s1333_s25, %s1156_s30  ;;  %p1158_p1 = pneg %p1337_p13 }
  0x16   : > { %s1161_s4 = scalar_lea.hbm %s1499_s0, 1024  ;;  %p1162_p4 = scmp.lt.u32.totalorder %s1333_s25, %s1499_s0 }
  0x17   : > { %p1159_p2 = pnand %p1158_p1, %p1157_p0  ;;  %p1163_p5 = scmp.lt.u32.totalorder %s1161_s4, %s1156_s30 }
  0x18   : > { %p1165_p8 = scmp.lt.u32.totalorder %s1156_s30, %s1333_s25 }
  0x19   : > { %p1160_p3 = pneg %p1159_p2  ;;  %p1164_p7 = por %p1163_p5, %p1162_p4 }
  0x1b   : > { %p1166_p10 = por %p1165_p8, %p1164_p7 }
  0x1d   : > { %p1167_p9 = pnand %p1166_p10, %p1160_p3 }
  0x1f   : > { %1170 = shalt.err (!%p1167_p9)
}
  0x20   : > { %s1171_s13 = scalar_lea.vmem %s1341_s27, 512  ;;  %s1254_s14 = smov [#allocation2]  }
  0x21   : > { %p1172_p0 = scmp.ne.s32.totalorder %s1341_s27, %s1171_s13  ;;  %s1176_s16 = sshll.u32 %s1254_s14, 4  ;;  %s1177_s16 = int_to_ptr.vmem [resolvable:$false] %s1176_s16 }
  0x22   : > { %s1178_s20 = scalar_lea.vmem %s1177_s16, 1024  ;;  %p1179_p11 = scmp.lt.s32.totalorder %s1341_s27, %s1177_s16 }
  0x23   : > { %p1174_p2 = pnand %p1172_p0, %p1158_p1  ;;  %p1180_p4 = scmp.lt.s32.totalorder %s1178_s20, %s1171_s13 }
  0x25   : > { %p1175_p12 = pneg %p1174_p2  ;;  %p1181_p5 = por %p1180_p4, %p1179_p11 }
  0x27   : > { %p1182_p7 = pnand %p1181_p5, %p1175_p12 }
  0x29   : > { %1185 = shalt.err (!%p1182_p7)
}
  0x2a   : > { %s1255_s21 = smov 128   ;;  %s1256_s22 = smov 8  }
  0x2b   : > { %1112 = dma.hbm_to_vmem [thread:$0]  (!%p1337_p13), %s1333_s25, 512, %s1341_s27, %s1343_s29, %s1255_s21, %s1255_s21, %s1256_s22  }
  0x2c   : > { %p895_p9 = scmp.ge.s32.totalorder %s1252_s9, 1  ;;  %p106_p1 = scmp.lt.s32.totalorder %s1252_s9, 3 }
  0x2e   : > { %p107_p3 = pnand %p895_p9, %p106_p1 }
  0x2f   : > { %s1374_s23 = sand.u32 (!%p107_p3), 1, %s1244_s7  }
  0x30   : > { %110 = sbr.rel (%p107_p3) target bundleno = 457 (0x1c9), region = 24  ;;  %s896_s24 = sshll.u32 (!%p107_p3), %s1374_s23, 5 }
  0x31   : > { %s113_s26 = scalar_lea.sflag (!%p107_p3), [#allocation3], %s1374_s23  ;;  %s116_s30 = scalar_lea.vmem (!%p107_p3), [#allocation2], %s896_s24 }
  0x37   : > { %1231 = dma.done.wait (%p1313_p6), %s113_s26, 512  }
  0x38   : > { %1233 = vsyncadd (%p1313_p6), %s113_s26, 4294966784  ;;  %vm139_vm0 = vcmask 261120   ;;  %v135_v0 = vld [vmem:[%s116_s30] sm:$0xff]  ;;  %v136_v1 = vld [vmem:[%s116_s30 + $0x8] sm:$0xff]  ;;  %s134_s17 = scalar_lea.vmem [#allocation5], %s896_s24  ;;  %s904_s27 = sshll.u32 %s1291_s10, 9 }
  0x39   : > { %v137_v2 = vld [vmem:[%s116_s30 + $0x10] sm:$0xff]  ;;  %v153_v3 = vand.u32 4294901760, %v135_v0  ;;  %v156_v4 = vand.u32 4294901760, %v136_v1  ;;  %v138_v5 = vld [vmem:[%s116_s30 + $0x18] sm:$0xff]  ;;  %v141_v7 = vsel %vm139_vm0, %v135_v0, 0  ;;  %v144_v10 = vsel %vm139_vm0, %v136_v1, 0  ;;  %s1454_s2 = scalar_lea.hbm %s1500_s1, %s904_s27 }
  0x3a   : > { %v159_v6 = vand.u32 4294901760, %v137_v2  ;;  %v162_v8 = vand.u32 4294901760, %v138_v5  ;;  %v1385_v9 = vand.u32 4294901760, %v141_v7  ;;  %v147_v11 = vsel %vm139_vm0, %v137_v2, 0  ;;  %s816_s25 = sshll.u32 %s134_s17, 4  ;;  %s803_s3 = scalar_lea.sflag [#allocation4], %s1374_s23  ;;  %s1448_s25 = int_to_ptr.vmem [resolvable:$true] %s816_s25 }
  0x3b   : > { %v1389_v12 = vpack.c.bf16 %v156_v4, %v153_v3  ;;  %v1391_v13 = vand.u32 4294901760, %v144_v10  ;;  %v263_v14 = vsub.f32 %v135_v0, %v153_v3  ;;  %v270_v15 = vsub.f32 %v136_v1, %v156_v4  ;;  %s1186_s4 = scalar_lea.vmem %s1448_s25, 512  ;;  %p1507_p11 = scmp.ne.s32.totalorder %s1504_s18, 0 }
  0x3c   : > { %v1393_v16 = vpack.c.bf16 %v162_v8, %v159_v6  ;;  %v1396_v17 = vsub.f32 %v141_v7, %v1385_v9  ;;  %v1398_v18 = vand.u32 4294901760, %v147_v11  ;;  %v150_v19 = vsel %vm139_vm0, %v138_v5, 0  ;;  %p1187_p6 = scmp.ne.s32.totalorder %s1448_s25, %s1186_s4  ;;  %s1257_s10 = smov [#allocation5]  }
  0x3d   : > { %1038 = vmatprep.subr.bf16.mxu1 %v1389_v12  ;;  %1062 = vmatprep.subr.bf16.mxu0 %v1389_v12  ;;  %v1404_v20 = vsub.f32 %v144_v10, %v1391_v13  ;;  %v264_v21 = vand.u32 4294901760, %v263_v14  ;;  %v271_v22 = vand.u32 4294901760, %v270_v15  ;;  %v1406_v23 = vand.u32 4294901760, %v150_v19  ;;  %s1190_s5 = sshll.u32 %s1257_s10, 4  ;;  %s1191_s5 = int_to_ptr.vmem [resolvable:$false] %s1190_s5 }
  0x3e   : > { %1040 = vmatpush3.bf16.msra.mxu1 %v1389_v12  ;;  %1064 = vmatpush3.bf16.msra.mxu0 %v1389_v12  ;;  %v223_v24 = vand.u32 4294901760, %v1396_v17  ;;  %v1412_v25 = vsub.f32 %v147_v11, %v1398_v18  ;;  %v277_v26 = vsub.f32 %v137_v2, %v159_v6  ;;  %v284_v27 = vsub.f32 %v138_v5, %v162_v8  ;;  %p1188_p12 = pnand %p1187_p6, %p1507_p11  ;;  %s1192_s11 = scalar_lea.vmem %s1191_s5, 1024 }
  0x3f   : > { %1042 = vmatprep.subr.bf16.mxu1 %v1393_v16  ;;  %1066 = vmatprep.subr.bf16.mxu0 %v1393_v16  ;;  %v233_v28 = vand.u32 4294901760, %v1404_v20  ;;  %v265_v29 = vsub.f32 %v263_v14, %v264_v21  ;;  %v272_v30 = vsub.f32 %v270_v15, %v271_v22  ;;  %v1069_v31 = vpack.c.bf16 %v271_v22, %v264_v21  ;;  %p1193_p8 = scmp.lt.s32.totalorder %s1448_s25, %s1191_s5  ;;  %p1194_p10 = scmp.lt.s32.totalorder %s1192_s11, %s1186_s4 }
  0x40   : > { %v224_v32 = vsub.f32 %v1396_v17, %v223_v24  ;;  %1003 = vmatprep.mubr.f32.mxu0 %v223_v24  ;;  %v243_v33 = vand.u32 4294901760, %v1412_v25  ;;  %v252_v34 = vsub.f32 %v150_v19, %v1406_v23  ;;  %v278_v35 = vand.u32 4294901760, %v277_v26  ;;  %p1189_p13 = pneg %p1188_p12 }
  0x41   : > { %v234_v36 = vsub.f32 %v1404_v20, %v233_v28  ;;  %v266_v37 = vand.u32 4294901760, %v265_v29  ;;  %v273_v38 = vand.u32 4294901760, %v272_v30  ;;  %v285_v39 = vand.u32 4294901760, %v284_v27  ;;  %p1195_p0 = por %p1194_p10, %p1193_p8 }
  0x42   : > { %1044 = vmatpush3.bf16.msra.mxu1 %v1393_v16  ;;  %1068 = vmatpush3.bf16.msra.mxu0 %v1393_v16  ;;  %v225_v40 = vand.u32 4294901760, %v224_v32  ;;  %v244_v41 = vsub.f32 %v1412_v25, %v243_v33  ;;  %v253_v42 = vand.u32 4294901760, %v252_v34  ;;  %v279_v43 = vsub.f32 %v277_v26, %v278_v35 }
  0x43   : > { %v235_v44 = vand.u32 4294901760, %v234_v36  ;;  %v1045_v45 = vpack.c.bf16 %v273_v38, %v266_v37  ;;  %1070 = vmatprep.subr.bf16.mxu0 %v1069_v31  ;;  %v286_v46 = vsub.f32 %v284_v27, %v285_v39  ;;  %v1073_v50 = vpack.c.bf16 %v285_v39, %v278_v35  ;;  %p1196_p2 = pnand %p1195_p0, %p1189_p13 }
  0x44   : > { %961 = vmatprep.mubr.f32.mxu1 %v225_v40  ;;  %v245_v47 = vand.u32 4294901760, %v244_v41  ;;  %v254_v48 = vsub.f32 %v252_v34, %v253_v42  ;;  %v280_v49 = vand.u32 4294901760, %v279_v43  ;;  %v1053_v54 = vpack.c.bf16 %v270_v15, %v263_v14 }
  0x45   : > { %962 = vmatmul.mubr.f32.vlgmr.msra.gmra.mrb[0].mxu1 %v235_v44  ;;  %1046 = vmatprep.subr.bf16.mxu1 %v1045_v45  ;;  %v287_v51 = vand.u32 4294901760, %v286_v46  ;;  %v1057_v55 = vpack.c.bf16 %v284_v27, %v277_v26 }
  0x46   : > { %1004 = vmatmul.mubr.f32.vlgmr.msra.gmra.mrb[0].mxu0 %v233_v28  ;;  %1048 = vmatpush3.bf16.msra.mxu1 %v1045_v45  ;;  %v255_v52 = vand.u32 4294901760, %v254_v48 }
  0x47   : > { %1072 = vmatpush3.bf16.msra.mxu0 %v1069_v31  ;;  %964 = vmatprep.mubr.f32.mxu1 %v245_v47  ;;  %v1049_v53 = vpack.c.bf16 %v287_v51, %v280_v49 }
  0x48   : > { %1006 = vmatprep.mubr.f32.mxu0 %v243_v33  ;;  %1074 = vmatprep.subr.bf16.mxu0 %v1073_v50 }
  0x49   : > { %965 = vmatmul.mubr.f32.gmra.mrb[2].mxu1 %v255_v52  ;;  %1050 = vmatprep.subr.bf16.mxu1 %v1049_v53 }
  0x4a   : > { %1007 = vmatmul.mubr.f32.gmra.mrb[2].mxu0 %v253_v42  ;;  %1052 = vmatpush3.bf16.msra.mxu1 %v1049_v53 }
  0x4b   : > { %1076 = vmatpush3.bf16.msra.mxu0 %v1073_v50  ;;  %975 = vmatprep.mubr.f32.mxu1 %v1385_v9 }
  0x4c   : > { %1017 = vmatprep.mubr.f32.mxu0 %v1385_v9  ;;  %1054 = vmatprep.subr.bf16.mxu1 %v1053_v54 }
  0x4d   : > { %976 = vmatmul.mubr.f32.vlgmr.msra.gmra.mrb[0].mxu1 %v1391_v13  ;;  %1078 = vmatprep.subr.bf16.mxu0 %v1389_v12 }
  0x4e   : > { %1018 = vmatmul.mubr.f32.vlgmr.msra.gmra.mrb[0].mxu0 %v1391_v13  ;;  %1056 = vmatpush3.bf16.msra.mxu1 %v1053_v54 }
  0x4f   : > { %1080 = vmatpush3.bf16.msra.mxu0 %v1389_v12  ;;  %978 = vmatprep.mubr.f32.mxu1 %v1398_v18 }
  0x50   : > { %1020 = vmatprep.mubr.f32.mxu0 %v1398_v18  ;;  %1058 = vmatprep.subr.bf16.mxu1 %v1057_v55 }
  0x51   : > { %979 = vmatmul.mubr.f32.gmra.mrb[2].mxu1 %v1406_v23  ;;  %1082 = vmatprep.subr.bf16.mxu0 %v1393_v16 }
  0x52   : > { %1021 = vmatmul.mubr.f32.gmra.mrb[2].mxu0 %v1406_v23  ;;  %1060 = vmatpush3.bf16.msra.mxu1 %v1057_v55 }
  0x53   : > { %1084 = vmatpush3.bf16.msra.mxu0 %v1393_v16  ;;  %989 = vmatprep.mubr.f32.mxu1 %v1396_v17 }
  0x54   : > { %1031 = vmatprep.mubr.f32.mxu0 %v1385_v9 }
  0x55   : > { %990 = vmatmul.mubr.f32.vlgmr.msra.gmra.mrb[0].mxu1 %v1404_v20 }
  0x56   : > { %1032 = vmatmul.mubr.f32.vlgmr.msra.gmra.mrb[0].mxu0 %v1391_v13  ;;  %992 = vmatprep.mubr.f32.mxu1 %v1412_v25 }
  0x57   : > { %1034 = vmatprep.mubr.f32.mxu0 %v1398_v18 }
  0x59   : > { %993 = vmatmul.mubr.f32.gmra.mrb[2].mxu1 %v252_v34 }
  0x5a   : > { %1035 = vmatmul.mubr.f32.gmra.mrb[2].mxu0 %v1406_v23 }
 0x128   : > { %v991_v56 = vpop.f32.mrb[0].mxu1 }
 0x129   : > { %v1033_v57 = vpop.f32.mrb[0].mxu0  ;;  %v446_v58 = vpop.f32.mrb[1].mxu1 }
 0x12a   : > { %v1085_v59 = vadd.f32 %v1033_v57, %v991_v56  ;;  %v744_v60 = vpop.f32.mrb[1].mxu0 }
 0x12b   : > { %v1086_v61 = vadd.f32 %v744_v60, %v446_v58 }
 0x12c   : > { %v994_v62 = vpop.f32.mrb[2].mxu1 }
 0x12d   : > { %v1036_v63 = vpop.f32.mrb[2].mxu0  ;;  %766 = vxpose.xlu0.b32.start [1/4] (short) (narrow) %v1086_v61, 32  ;;  %v460_v0 = vpop.f32.mrb[3].mxu1 }
 0x12e   : > { %v1087_v1 = vadd.f32 %v1036_v63, %v994_v62  ;;  %v756_v2 = vpop.f32.mrb[3].mxu0 }
 0x12f   : > { %v1088_v3 = vadd.f32 %v756_v2, %v460_v0 }
 0x131   : > { %767 = vxpose.xlu0.b32.cont [2/4] (short) (narrow) %v1085_v59, 32 }
 0x135   : > { %768 = vxpose.xlu0.b32.cont [3/4] (short) (narrow) %v1088_v3, 32 }
 0x139   : > { %769 = vxpose.xlu0.b32.end [4/4] (short) (narrow) %v1087_v1, 32 }
 0x1ad   : > { %v782_v4 = vpop.trf.xlu0 }
 0x1ae   : > { %798 = vst.msk [vmem:[%s134_s17] sm:$0xff] %vm139_vm0, %v782_v4 }
 0x1b1   : > { %v783_v5 = vpop.trf.xlu0 }
 0x1b2   : > { %799 = vst.msk [vmem:[%s134_s17 + $0x8] sm:$0xff] %vm139_vm0, %v783_v5 }
 0x1b5   : > { %v784_v6 = vpop.trf.xlu0 }
 0x1b6   : > { %800 = vst.msk [vmem:[%s134_s17 + $0x10] sm:$0xff] %vm139_vm0, %v784_v6 }
 0x1b9   : > { %v785_v7 = vpop.trf.xlu0 }
 0x1ba   : > { %801 = vst.msk [vmem:[%s134_s17 + $0x18] sm:$0xff] %vm139_vm0, %v785_v7 }
 0x1bb   : > { %1199 = shalt.err (!%p1196_p2)
}
 0x1bc   : > { %s1200_s13 = scalar_lea.hbm %s1454_s2, 512  ;;  %s1204_s20 = scalar_lea.hbm %s1500_s1, 1024 }
 0x1bd   : > { %p1201_p4 = scmp.ne.s32.totalorder %s1454_s2, %s1200_s13  ;;  %p1205_p9 = scmp.lt.u32.totalorder %s1454_s2, %s1500_s1 }
 0x1be   : > { %p1206_p1 = scmp.lt.u32.totalorder %s1204_s20, %s1200_s13  ;;  %p1208_p6 = scmp.lt.u32.totalorder %s1200_s13, %s1454_s2 }
 0x1bf   : > { %p1202_p5 = pnand %p1201_p4, %p1507_p11 }
 0x1c0   : > { %p1207_p3 = por %p1206_p1, %p1205_p9 }
 0x1c1   : > { %p1203_p7 = pneg %p1202_p5 }
 0x1c2   : > { %p1209_p12 = por %p1208_p6, %p1207_p3 }
 0x1c4   : > { %p1210_p13 = pnand %p1209_p12, %p1203_p7 }
 0x1c6   : > { %1213 = shalt.err (!%p1210_p13)
}
 0x1c7   : > { %s1258_s24 = smov 128   ;;  %s1259_s26 = smov 8  }
 0x1c8   : > { %1107 = dma.vmem_to_hbm [thread:$0]  (%p1507_p11), %s1448_s25, 512, %s1454_s2, %s803_s3, %s1258_s24, %s1258_s24, %s1259_s26  }
 0x1c9 PF: > { %s831_s30 = sand.u32 1, %s1240_s6   ;;  %p1508_p8 = scmp.ne.s32.totalorder %s1505_s19, 0 }
 0x1ca   : > { %p1509_p10 = scmp.ge.s32.totalorder %s1252_s9, 2  ;;  %s832_s17 = scalar_lea.sflag [#allocation4], %s831_s30 }
 0x1cc   : > { %p1114_p0 = pnand %p1509_p10, %p1508_p8 }
 0x1ce   : > { %1235 = dma.done.wait (!%p1114_p0), %s832_s17, 512  }
 0x1cf   : > { %1237 = vsyncadd (!%p1114_p0), %s832_s17, 4294966784  ;;  %p14_p2 = scmp.ge.s32.totalorder %s1295_s12, 4   ;;  %s1510_s6 = smov %s1244_s7 }
 0x1d0   : > { %s1511_s7 = smov %s1248_s8  ;;  %s1512_s8 = smov %s1307_s15 }
 0x1d1   : > { %s1513_s9 = smov %s1295_s12  ;;  %16 = sbr.rel (!%p14_p2) target bundleno = 5 (0x5), region = 69 }
 0x1d8   :  { %837 = vsyncpa [#allocation3], 1 }
 0x1d9   :  { %839 = vsyncpa [#allocation3 + $0x1], 1 }
 0x1da   :  { %840 = vsyncpa [#allocation4], 1 }
 0x1db   :  { %842 = vsyncpa [#allocation4 + $0x1], 1 }

</bundles_post_ra>
